<compile_context>
chip_gen: v6e
topology: v6e:2x2x1
jax: 0.10.0
libtpu: 0.0.40
codegen_flags: <defaults>
</compile_context>

<pallas_src>
import jax
import jax.numpy as jnp
from jax import lax
from jax.experimental import pallas as pl
from jax.experimental.pallas import tpu as pltpu

HIDDEN = 256
LN_EPS = 1e-5  # torch.nn.LayerNorm default


def _round_up(x, m):
    return (x + m - 1) // m * m


def _pick_tb(B, cap=512):
    """Batch tile size.

    Large tiles amortize the ~0.35 us per-grid-step overhead (cap=512 is a
    multiple of both 128 (v5e) and 256 (v6e/v7x) and its working set is only a
    couple of MiB, far below any generation's scoped-VMEM limit).  Once B is
    big enough to split we keep >= 2 grid steps so the "parallel" batch axis
    can be sharded across v7x's two TensorCores instead of idling one.
    """
    if B <= 32:
        return _round_up(max(B, 8), 8)        # tiny inference batch: one tile
    if B <= 2 * cap:
        return _round_up(pl.cdiv(B, 2), 16)   # moderate: exactly 2 grid steps
    return cap                                 # large: 512-row tiles


def _layernorm(h, gamma, beta):
    # f32 statistics; centered term hoisted so the VPU subtracts once.
    mu = jnp.mean(h, axis=-1, keepdims=True)
    centered = h - mu
    var = jnp.mean(centered * centered, axis=-1, keepdims=True)
    return centered * lax.rsqrt(var + LN_EPS) * gamma + beta


def adaptive_learner_kernel(x_ref, w1_ref, w2_ref, pvec_ref, wh_ref, bh_ref, out_ref):
    # f32 input cast to bf16 on-chip (removes a separate XLA cast/pad pass and
    # the extra HBM round-trip it implies).
    x = x_ref[...].astype(jnp.bfloat16)  # [TB, state_dim]

    # Packed bias / LayerNorm vectors: rows of one (8, 256) f32 block.
    b1, g1, be1 = pvec_ref[0:1, :], pvec_ref[1:2, :], pvec_ref[2:3, :]
    b2, g2, be2 = pvec_ref[3:4, :], pvec_ref[4:5, :], pvec_ref[5:6, :]

    # --- Linear(state_dim -> 256) + LayerNorm + ReLU --------------------------
    h = jnp.dot(x, w1_ref[...], preferred_element_type=jnp.float32) + b1
    h = _layernorm(h, g1, be1)
    h = jnp.maximum(h, 0.0).astype(jnp.bfloat16)

    # --- Linear(256 -> 256) + LayerNorm + ReLU ---------------------------------
    h = jnp.dot(h, w2_ref[...], preferred_element_type=jnp.float32) + b2
    h = _layernorm(h, g2, be2)
    feats = jnp.maximum(h, 0.0).astype(jnp.bfloat16)

    # --- fused heads: Linear(256 -> A) || Linear(256 -> 1), lane-padded --------
    out = jnp.dot(feats, wh_ref[...], preferred_element_type=jnp.float32) + bh_ref[...]
    out_ref[...] = out.astype(out_ref.dtype)  # bf16 store: halves HBM writeback


def prepare_params(params, action_dim):
    """Fuse + lane-pad the two heads, pack the small per-channel vectors and
    cast matmul weights to bf16 (done once, outside the hot path)."""
    hp = _round_up(action_dim + 1, 128)
    w_heads = jnp.zeros((HIDDEN, hp), jnp.float32)
    w_heads = w_heads.at[:, :action_dim].set(params["w3"])
    w_heads = w_heads.at[:, action_dim:action_dim + 1].set(params["wv"])
    b_heads = jnp.zeros((1, hp), jnp.float32)
    b_heads = b_heads.at[:, :action_dim].set(params["b3"])
    b_heads = b_heads.at[:, action_dim:action_dim + 1].set(params["bv"])

    # Pack the six (1, 256) f32 vectors into ONE sublane-aligned (8, 256) block
    # (2 pad rows): a single DMA / VMEM tile instead of six padded ones.
    pvec = jnp.zeros((8, HIDDEN), jnp.float32)
    for row, name in enumerate(("b1", "g1", "be1", "b2", "g2", "be2")):
        pvec = pvec.at[row].set(params[name].reshape(-1))

    return dict(
        w1=params["w1"].astype(jnp.bfloat16),
        w2=params["w2"].astype(jnp.bfloat16),
        pvec=pvec,
        w_heads=w_heads.astype(jnp.bfloat16),
        b_heads=b_heads,
        action_dim=action_dim,
        head_pad=hp,
    )


def adaptive_learner_forward(state, prep, *, tb=None, out_dtype=jnp.bfloat16):
    """state: [B, state_dim] f32. Returns (action_scores [B, A], value [B, 1]) f32."""
    B, state_dim = state.shape
    A = prep["action_dim"]
    hp = prep["head_pad"]

    if tb is None:
        tb = _pick_tb(B)
    grid = (pl.cdiv(B, tb),)  # partial last block handled by Pallas; no pad copy

    args = (
        state,
        prep["w1"], prep["w2"], prep["pvec"], prep["w_heads"], prep["b_heads"],
    )

    # Activations tiled over the batch grid; parameters pinned at block (0, 0)
    # and single-buffered (constant index_map => fetched once, VMEM-resident).
    pinned = pl.Buffered(1)
    in_specs = [pl.BlockSpec((tb, state_dim), lambda i: (i, 0))]
    in_specs += [
        pl.BlockSpec(a.shape, lambda i: (0, 0), pipeline_mode=pinned)
        for a in args[1:]
    ]
    out_spec = pl.BlockSpec((tb, hp), lambda i: (i, 0))

    flops = 2 * B * (state_dim * HIDDEN + HIDDEN * HIDDEN + HIDDEN * hp)
    bytes_accessed = int(
        state.size * state.dtype.itemsize
        + sum(a.size * a.dtype.itemsize for a in args[1:])
        + B * hp * jnp.dtype(out_dtype).itemsize
    )
    cost = pl.CostEstimate(
        flops=flops, transcendentals=2 * B, bytes_accessed=bytes_accessed
    )

    out = pl.pallas_call(
        adaptive_learner_kernel,
        out_shape=jax.ShapeDtypeStruct((B, hp), out_dtype),
        grid=grid,
        in_specs=in_specs,
        out_specs=out_spec,
        compiler_params=pltpu.CompilerParams(dimension_semantics=("parallel",)),
        cost_estimate=cost,
    )(*args)

    # Slice the fused heads back out; return f32 for interface parity with torch.
    return (
        out[:, :A].astype(jnp.float32),
        out[:, A:A + 1].astype(jnp.float32),
    )


def init_params(key, state_dim, action_dim):
    """Deterministic PyTorch-style init. Linear weights stored as [in, out], f32."""
    ks = jax.random.split(key, 8)

    def linear(kw, kb, fan_in, fan_out):
        bound = 1.0 / jnp.sqrt(fan_in)
        w = jax.random.uniform(kw, (fan_in, fan_out), jnp.float32, -bound, bound)
        b = jax.random.uniform(kb, (1, fan_out), jnp.float32, -bound, bound)
        return w, b

    w1, b1 = linear(ks[0], ks[1], state_dim, HIDDEN)
    w2, b2 = linear(ks[2], ks[3], HIDDEN, HIDDEN)
    w3, b3 = linear(ks[4], ks[5], HIDDEN, action_dim)
    wv, bv = linear(ks[6], ks[7], HIDDEN, 1)

    # nn.LayerNorm default init: weight=1, bias=0
    ones = jnp.ones((1, HIDDEN), jnp.float32)
    zeros = jnp.zeros((1, HIDDEN), jnp.float32)

    return dict(
        w1=w1, b1=b1, g1=ones, be1=zeros,
        w2=w2, b2=b2, g2=ones, be2=zeros,
        w3=w3, b3=b3,
        wv=wv, bv=bv,
    )


def _reference_forward(state, prep):
    """Pure-JAX reference mirroring the kernel's precision choices (bf16 matmul
    inputs, f32 accumulation / LayerNorm, f32 final add)."""

    def ln(h, g, b):
        mu = jnp.mean(h, -1, keepdims=True)
        c = h - mu
        var = jnp.mean(c * c, -1, keepdims=True)
        return c * lax.rsqrt(var + LN_EPS) * g + b

    pv = prep["pvec"]
    b1, g1, be1 = pv[0:1], pv[1:2], pv[2:3]
    b2, g2, be2 = pv[3:4], pv[4:5], pv[5:6]

    x = state.astype(jnp.bfloat16)
    h = jnp.dot(x, prep["w1"], preferred_element_type=jnp.float32) + b1
    h = jnp.maximum(ln(h, g1, be1), 0.0).astype(jnp.bfloat16)
    h = jnp.dot(h, prep["w2"], preferred_element_type=jnp.float32) + b2
    f = jnp.maximum(ln(h, g2, be2), 0.0).astype(jnp.bfloat16)
    out = jnp.dot(f, prep["w_heads"], preferred_element_type=jnp.float32) + prep["b_heads"]
    A = prep["action_dim"]
    return out[:, :A], out[:, A:A + 1]


# TODO(synk): update() (Adam step, advantage/entropy losses) and the Experience
# replay buffer are host-side training logic, not part of the forward kernel.

if __name__ == "__main__":
    key = jax.random.PRNGKey(0)
    k_state, k_params, k_state2 = jax.random.split(key, 3)

    batch, state_dim, action_dim = 8, 32, 8
    state = jax.random.normal(k_state, (batch, state_dim), jnp.float32)
    params = init_params(k_params, state_dim, action_dim)
    prep = prepare_params(params, action_dim)

    scores, value = adaptive_learner_forward(state, prep)
    jax.block_until_ready((scores, value))

    ref_scores, ref_value = _reference_forward(state, prep)
    assert scores.shape == (batch, action_dim) and value.shape == (batch, 1)
    assert jnp.allclose(scores, ref_scores, atol=2e-2, rtol=2e-2)
    assert jnp.allclose(value, ref_value, atol=2e-2, rtol=2e-2)

    # Non-divisible batch: exercises the no-pad / partial-last-block path and
    # the >=2-grid-step (v7x dual TensorCore) tile heuristic.
    batch2 = 130
    state2 = jax.random.normal(k_state2, (batch2, state_dim), jnp.float32)
    scores2, value2 = adaptive_learner_forward(state2, prep)
    jax.block_until_ready((scores2, value2))

    ref_scores2, ref_value2 = _reference_forward(state2, prep)
    assert scores2.shape == (batch2, action_dim) and value2.shape == (batch2, 1)
    assert jnp.allclose(scores2, ref_scores2, atol=2e-2, rtol=2e-2)
    assert jnp.allclose(value2, ref_value2, atol=2e-2, rtol=2e-2)

    print("KERNEL_OK")
</pallas_src>

<mosaic_0001>
module attributes {stable_mosaic.version = 11 : i64} {
  func.func @adaptive_learner_kernel(%arg0: i32, %arg1: memref<8x32xf32, #tpu.memory_space<vmem>>, %arg2: memref<32x256xbf16, #tpu.memory_space<vmem>>, %arg3: memref<256x256xbf16, #tpu.memory_space<vmem>>, %arg4: memref<8x256xf32, #tpu.memory_space<vmem>>, %arg5: memref<256x128xbf16, #tpu.memory_space<vmem>>, %arg6: memref<1x128xf32, #tpu.memory_space<vmem>>, %arg7: memref<8x128xbf16, #tpu.memory_space<vmem>>) attributes {dimension_semantics = [#tpu.dimension_semantics<parallel>], iteration_bounds = array<i64: 1>, scalar_prefetch = 0 : i64, scratch_operands = 0 : i64, tpu.core_type = #tpu.core_type<tc>, window_params = [{transform_indices = @transform_0, window_bounds = array<i64: 8, 32>}, {pipeline_mode = #tpu.pipeline_mode<synchronous>, transform_indices = @transform_1, window_bounds = array<i64: 32, 256>}, {pipeline_mode = #tpu.pipeline_mode<synchronous>, transform_indices = @transform_2, window_bounds = array<i64: 256, 256>}, {pipeline_mode = #tpu.pipeline_mode<synchronous>, transform_indices = @transform_3, window_bounds = array<i64: 8, 256>}, {pipeline_mode = #tpu.pipeline_mode<synchronous>, transform_indices = @transform_4, window_bounds = array<i64: 256, 128>}, {pipeline_mode = #tpu.pipeline_mode<synchronous>, transform_indices = @transform_5, window_bounds = array<i64: 1, 128>}, {transform_indices = @transform_6, window_bounds = array<i64: 8, 128>}]} {
    %c0 = arith.constant 0 : index
    %c0_0 = arith.constant 0 : index
    %0 = vector.load %arg1[%c0, %c0_0] : memref<8x32xf32, #tpu.memory_space<vmem>>, vector<8x32xf32>
    %1 = arith.truncf %0 : vector<8x32xf32> to vector<8x32xbf16>
    %c0_1 = arith.constant 0 : index
    %c0_2 = arith.constant 0 : index
    %2 = vector.load %arg4[%c0_1, %c0_2] : memref<8x256xf32, #tpu.memory_space<vmem>>, vector<1x256xf32>
    %c1 = arith.constant 1 : index
    %c0_3 = arith.constant 0 : index
    %3 = vector.load %arg4[%c1, %c0_3] : memref<8x256xf32, #tpu.memory_space<vmem>>, vector<1x256xf32>
    %c2 = arith.constant 2 : index
    %c0_4 = arith.constant 0 : index
    %4 = vector.load %arg4[%c2, %c0_4] : memref<8x256xf32, #tpu.memory_space<vmem>>, vector<1x256xf32>
    %c3 = arith.constant 3 : index
    %c0_5 = arith.constant 0 : index
    %5 = vector.load %arg4[%c3, %c0_5] : memref<8x256xf32, #tpu.memory_space<vmem>>, vector<1x256xf32>
    %c4 = arith.constant 4 : index
    %c0_6 = arith.constant 0 : index
    %6 = vector.load %arg4[%c4, %c0_6] : memref<8x256xf32, #tpu.memory_space<vmem>>, vector<1x256xf32>
    %c5 = arith.constant 5 : index
    %c0_7 = arith.constant 0 : index
    %7 = vector.load %arg4[%c5, %c0_7] : memref<8x256xf32, #tpu.memory_space<vmem>>, vector<1x256xf32>
    %c0_8 = arith.constant 0 : index
    %c0_9 = arith.constant 0 : index
    %8 = vector.load %arg2[%c0_8, %c0_9] : memref<32x256xbf16, #tpu.memory_space<vmem>>, vector<32x256xbf16>
    %cst = arith.constant dense<0.000000e+00> : vector<8x256xf32>
    %9 = tpu.matmul %1, %8, %cst {dimension_numbers = #tpu.dot_dimension_numbers<[1], [0], [0], [1], [0, 0, 1, 1], [], []>} : vector<8x32xbf16>, vector<32x256xbf16>, vector<8x256xf32> -> vector<8x256xf32>
    %10 = vector.broadcast %2 : vector<1x256xf32> to vector<8x256xf32>
    %11 = arith.addf %9, %10 : vector<8x256xf32>
    %cst_10 = arith.constant dense<0.000000e+00> : vector<8xf32>
    %12 = vector.multi_reduction <add>, %11, %cst_10 [1] : vector<8x256xf32> to vector<8xf32>
    %13 = vector.shape_cast %12 : vector<8xf32> to vector<8x1xf32>
    %cst_11 = arith.constant 2.560000e+02 : f32
    %14 = vector.broadcast %cst_11 : f32 to vector<8x1xf32>
    %15 = arith.divf %13, %14 : vector<8x1xf32>
    %16 = vector.broadcast %15 : vector<8x1xf32> to vector<8x256xf32>
    %17 = arith.subf %11, %16 : vector<8x256xf32>
    %18 = arith.mulf %17, %17 : vector<8x256xf32>
    %cst_12 = arith.constant dense<0.000000e+00> : vector<8xf32>
    %19 = vector.multi_reduction <add>, %18, %cst_12 [1] : vector<8x256xf32> to vector<8xf32>
    %20 = vector.shape_cast %19 : vector<8xf32> to vector<8x1xf32>
    %cst_13 = arith.constant 2.560000e+02 : f32
    %21 = vector.broadcast %cst_13 : f32 to vector<8x1xf32>
    %22 = arith.divf %20, %21 : vector<8x1xf32>
    %cst_14 = arith.constant 9.99999974E-6 : f32
    %23 = vector.broadcast %cst_14 : f32 to vector<8x1xf32>
    %24 = arith.addf %22, %23 : vector<8x1xf32>
    %25 = math.rsqrt %24 : vector<8x1xf32>
    %26 = vector.broadcast %25 : vector<8x1xf32> to vector<8x256xf32>
    %27 = arith.mulf %17, %26 : vector<8x256xf32>
    %28 = vector.broadcast %3 : vector<1x256xf32> to vector<8x256xf32>
    %29 = arith.mulf %27, %28 : vector<8x256xf32>
    %30 = vector.broadcast %4 : vector<1x256xf32> to vector<8x256xf32>
    %31 = arith.addf %29, %30 : vector<8x256xf32>
    %cst_15 = arith.constant 0.000000e+00 : f32
    %32 = vector.broadcast %cst_15 : f32 to vector<8x256xf32>
    %33 = arith.maximumf %31, %32 : vector<8x256xf32>
    %34 = arith.truncf %33 : vector<8x256xf32> to vector<8x256xbf16>
    %c0_16 = arith.constant 0 : index
    %c0_17 = arith.constant 0 : index
    %35 = vector.load %arg3[%c0_16, %c0_17] : memref<256x256xbf16, #tpu.memory_space<vmem>>, vector<256x256xbf16>
    %cst_18 = arith.constant dense<0.000000e+00> : vector<8x256xf32>
    %36 = tpu.matmul %34, %35, %cst_18 {dimension_numbers = #tpu.dot_dimension_numbers<[1], [0], [0], [1], [0, 0, 1, 1], [], []>} : vector<8x256xbf16>, vector<256x256xbf16>, vector<8x256xf32> -> vector<8x256xf32>
    %37 = vector.broadcast %5 : vector<1x256xf32> to vector<8x256xf32>
    %38 = arith.addf %36, %37 : vector<8x256xf32>
    %cst_19 = arith.constant dense<0.000000e+00> : vector<8xf32>
    %39 = vector.multi_reduction <add>, %38, %cst_19 [1] : vector<8x256xf32> to vector<8xf32>
    %40 = vector.shape_cast %39 : vector<8xf32> to vector<8x1xf32>
    %cst_20 = arith.constant 2.560000e+02 : f32
    %41 = vector.broadcast %cst_20 : f32 to vector<8x1xf32>
    %42 = arith.divf %40, %41 : vector<8x1xf32>
    %43 = vector.broadcast %42 : vector<8x1xf32> to vector<8x256xf32>
    %44 = arith.subf %38, %43 : vector<8x256xf32>
    %45 = arith.mulf %44, %44 : vector<8x256xf32>
    %cst_21 = arith.constant dense<0.000000e+00> : vector<8xf32>
    %46 = vector.multi_reduction <add>, %45, %cst_21 [1] : vector<8x256xf32> to vector<8xf32>
    %47 = vector.shape_cast %46 : vector<8xf32> to vector<8x1xf32>
    %cst_22 = arith.constant 2.560000e+02 : f32
    %48 = vector.broadcast %cst_22 : f32 to vector<8x1xf32>
    %49 = arith.divf %47, %48 : vector<8x1xf32>
    %cst_23 = arith.constant 9.99999974E-6 : f32
    %50 = vector.broadcast %cst_23 : f32 to vector<8x1xf32>
    %51 = arith.addf %49, %50 : vector<8x1xf32>
    %52 = math.rsqrt %51 : vector<8x1xf32>
    %53 = vector.broadcast %52 : vector<8x1xf32> to vector<8x256xf32>
    %54 = arith.mulf %44, %53 : vector<8x256xf32>
    %55 = vector.broadcast %6 : vector<1x256xf32> to vector<8x256xf32>
    %56 = arith.mulf %54, %55 : vector<8x256xf32>
    %57 = vector.broadcast %7 : vector<1x256xf32> to vector<8x256xf32>
    %58 = arith.addf %56, %57 : vector<8x256xf32>
    %cst_24 = arith.constant 0.000000e+00 : f32
    %59 = vector.broadcast %cst_24 : f32 to vector<8x256xf32>
    %60 = arith.maximumf %58, %59 : vector<8x256xf32>
    %61 = arith.truncf %60 : vector<8x256xf32> to vector<8x256xbf16>
    %c0_25 = arith.constant 0 : index
    %c0_26 = arith.constant 0 : index
    %62 = vector.load %arg5[%c0_25, %c0_26] : memref<256x128xbf16, #tpu.memory_space<vmem>>, vector<256x128xbf16>
    %cst_27 = arith.constant dense<0.000000e+00> : vector<8x128xf32>
    %63 = tpu.matmul %61, %62, %cst_27 {dimension_numbers = #tpu.dot_dimension_numbers<[1], [0], [0], [1], [0, 0, 1, 1], [], []>} : vector<8x256xbf16>, vector<256x128xbf16>, vector<8x128xf32> -> vector<8x128xf32>
    %c0_28 = arith.constant 0 : index
    %c0_29 = arith.constant 0 : index
    %64 = vector.load %arg6[%c0_28, %c0_29] : memref<1x128xf32, #tpu.memory_space<vmem>>, vector<1x128xf32>
    %65 = vector.broadcast %64 : vector<1x128xf32> to vector<8x128xf32>
    %66 = arith.addf %63, %65 : vector<8x128xf32>
    %67 = arith.truncf %66 : vector<8x128xf32> to vector<8x128xbf16>
    %c0_30 = arith.constant 0 : index
    %c0_31 = arith.constant 0 : index
    %68 = vector.load %arg7[%c0_30, %c0_31] : memref<8x128xbf16, #tpu.memory_space<vmem>>, vector<8x128xbf16>
    tpu.vector_store %arg7[%c0_30, %c0_31], %67 {strides = array<i32>} : memref<8x128xbf16, #tpu.memory_space<vmem>>, vector<8x128xbf16>,
    return
  }
  func.func @transform_0(%arg0: i32) -> (i32, i32) {
    %c0_i32 = arith.constant 0 : i32
    %c0_i32_0 = arith.constant 0 : i32
    return %arg0, %c0_i32 : i32, i32
  }
  func.func @transform_1(%arg0: i32) -> (i32, i32) {
    %c0_i32 = arith.constant 0 : i32
    %c0_i32_0 = arith.constant 0 : i32
    %c0_i32_1 = arith.constant 0 : i32
    return %c0_i32, %c0_i32_0 : i32, i32
  }
  func.func @transform_2(%arg0: i32) -> (i32, i32) {
    %c0_i32 = arith.constant 0 : i32
    %c0_i32_0 = arith.constant 0 : i32
    %c0_i32_1 = arith.constant 0 : i32
    return %c0_i32, %c0_i32_0 : i32, i32
  }
  func.func @transform_3(%arg0: i32) -> (i32, i32) {
    %c0_i32 = arith.constant 0 : i32
    %c0_i32_0 = arith.constant 0 : i32
    %c0_i32_1 = arith.constant 0 : i32
    return %c0_i32, %c0_i32_0 : i32, i32
  }
  func.func @transform_4(%arg0: i32) -> (i32, i32) {
    %c0_i32 = arith.constant 0 : i32
    %c0_i32_0 = arith.constant 0 : i32
    %c0_i32_1 = arith.constant 0 : i32
    return %c0_i32, %c0_i32_0 : i32, i32
  }
  func.func @transform_5(%arg0: i32) -> (i32, i32) {
    %c0_i32 = arith.constant 0 : i32
    %c0_i32_0 = arith.constant 0 : i32
    %c0_i32_1 = arith.constant 0 : i32
    return %c0_i32, %c0_i32_0 : i32, i32
  }
  func.func @transform_6(%arg0: i32) -> (i32, i32) {
    %c0_i32 = arith.constant 0 : i32
    %c0_i32_0 = arith.constant 0 : i32
    return %arg0, %c0_i32 : i32, i32
  }
}

</mosaic_0001>

<bundles_post_ra>
// kernel: tpu_custom_call.1
= control target key start
LH: loop header
LB: loop body
LE: loop exit
PB: predicated region body
PF: predicated region fallthrough
CT: control target
= control target key end

     0   :  { %11 = vsyncpa [#allocation3], 0  ;;  %s1091_s0 = inlined_call_operand.hbm [shape: f32[8,32], index: 0, kind: input, shape index: {}]   ;;  %s1092_s1 = inlined_call_operand.hbm [shape: bf16[32,256], index: 1, kind: input, shape index: {}]   ;;  %s1093_s2 = inlined_call_operand.hbm [shape: bf16[256,256], index: 2, kind: input, shape index: {}]   ;;  %s1094_s3 = inlined_call_operand.hbm [shape: f32[8,256], index: 3, kind: input, shape index: {}]   ;;  %s1095_s4 = inlined_call_operand.hbm [shape: bf16[256,128], index: 4, kind: input, shape index: {}]   ;;  %s1096_s5 = inlined_call_operand.vmem [shape: f32[1,128], index: 5, kind: input, shape index: {}]   ;;  %s1097_s6 = inlined_call_operand.hbm [shape: bf16[8,128], index: 6, kind: output, shape index: {}]  }
   0x1   :  { %12 = vsyncpa [#allocation6], 0 }
   0x2   :  { %13 = vsyncpa [#allocation9], 0 }
   0x3   :  { %14 = vsyncpa [#allocation4], 0  ;;  %s1002_s21 = smov [#allocation5]  }
   0x4   :  { %s30_s22 = sshll.u32 %s1002_s21, 4  ;;  %s31_s22 = int_to_ptr.vmem [resolvable:$true] %s30_s22 }
   0x5   :  { %s882_s23 = scalar_lea.vmem %s31_s22, 512  ;;  %p887_p1 = scmp.lt.s32.totalorder %s31_s22, %s31_s22 }
   0x6   :  { %p883_p0 = scmp.ne.s32.totalorder %s31_s22, %s882_s23  ;;  %p888_p2 = scmp.lt.s32.totalorder %s882_s23, %s882_s23 }
   0x8   :  { %p889_p3 = por %p888_p2, %p887_p1 }
   0xa   :  { %p890_p4 = pnand %p889_p3, %p883_p0 }
   0xc   :  { %893 = shalt.err (!%p890_p4)
}
   0xd   :  { %s1003_s24 = smov 128   ;;  %s1004_s25 = smov 8  }
   0xe   :  { %36 = dma.hbm_to_vmem [thread:$0]  %s1092_s1, 512, %s31_s22, [#allocation6], %s1003_s24, %s1003_s24, %s1004_s25  }
   0xf   :  { %s1005_s28 = smov [#allocation8]   ;;  %s1006_s30 = smov [#allocation2]  }
  0x10   :  { %s55_s29 = sshll.u32 %s1005_s28, 4  ;;  %s21_s7 = sshll.u32 %s1006_s30, 4  ;;  %s56_s29 = int_to_ptr.vmem [resolvable:$true] %s55_s29  ;;  %s22_s7 = int_to_ptr.vmem [resolvable:$true] %s21_s7 }
  0x11   :  { %s902_s8 = scalar_lea.vmem %s56_s29, 256  ;;  %p907_p6 = scmp.lt.s32.totalorder %s56_s29, %s56_s29 }
  0x12   :  { %p903_p5 = scmp.ne.s32.totalorder %s56_s29, %s902_s8  ;;  %p908_p7 = scmp.lt.s32.totalorder %s902_s8, %s902_s8 }
  0x14   :  { %p909_p8 = por %p908_p7, %p907_p6 }
  0x16   :  { %p910_p9 = pnand %p909_p8, %p903_p5 }
  0x18   :  { %913 = shalt.err (!%p910_p9)
}
  0x19   :  { %58 = dma.hbm_to_vmem [thread:$0]  %s1094_s3, 256, %s56_s29, [#allocation9]  }
  0x1a   :  { %s922_s11 = scalar_lea.vmem %s22_s7, 128  ;;  %p927_p11 = scmp.lt.s32.totalorder %s22_s7, %s22_s7 }
  0x1b   :  { %p923_p10 = scmp.ne.s32.totalorder %s22_s7, %s922_s11  ;;  %p928_p12 = scmp.lt.s32.totalorder %s922_s11, %s922_s11 }
  0x1d   :  { %p929_p13 = por %p928_p12, %p927_p11 }
  0x1f   :  { %p930_p0 = pnand %p929_p13, %p923_p10 }
  0x21   :  { %933 = shalt.err (!%p930_p0)
}
  0x22   :  { %24 = dma.hbm_to_vmem [thread:$0]  %s1091_s0, 128, %s22_s7, [#allocation3]  }
  0x23   :  { %s1007_s13 = smov [#allocation7]   ;;  %s1008_s15 = smov [#allocation10]  }
  0x24   :  { %s42_s14 = sshll.u32 %s1007_s13, 4  ;;  %s64_s16 = sshll.u32 %s1008_s15, 4  ;;  %s43_s14 = int_to_ptr.vmem [resolvable:$true] %s42_s14  ;;  %s65_s16 = int_to_ptr.vmem [resolvable:$true] %s64_s16 }
  0x25   :  { %s942_s17 = scalar_lea.vmem %s43_s14, 4096  ;;  %p947_p2 = scmp.lt.s32.totalorder %s43_s14, %s43_s14 }
  0x26   :  { %p943_p1 = scmp.ne.s32.totalorder %s43_s14, %s942_s17  ;;  %p948_p3 = scmp.lt.s32.totalorder %s942_s17, %s942_s17 }
  0x28   :  { %p949_p4 = por %p948_p3, %p947_p2 }
  0x2a   :  { %p950_p5 = pnand %p949_p4, %p943_p1 }
  0x2c   :  { %953 = shalt.err (!%p950_p5)
}
  0x2d   :  { %48 = dma.hbm_to_vmem [thread:$0]  %s1093_s2, 4096, %s43_s14, [#allocation6], %s1003_s24, %s1003_s24, %s1004_s25  }
  0x2e   :  { %s962_s0 = scalar_lea.vmem %s65_s16, 2048  ;;  %p967_p7 = scmp.lt.s32.totalorder %s65_s16, %s65_s16 }
  0x2f   :  { %p963_p6 = scmp.ne.s32.totalorder %s65_s16, %s962_s0  ;;  %p968_p8 = scmp.lt.s32.totalorder %s962_s0, %s962_s0 }
  0x31   :  { %p969_p9 = por %p968_p8, %p967_p7 }
  0x33   :  { %p970_p10 = pnand %p969_p9, %p963_p6 }
  0x35   :  { %973 = shalt.err (!%p970_p10)
}
  0x36   :  { %s1009_s19 = smov 64   ;;  %s1010_s20 = smov 4  }
  0x37   :  { %70 = dma.hbm_to_vmem [thread:$0]  %s1095_s4, 2048, %s65_s16, [#allocation9], %s1009_s19, %s1009_s19, %s1010_s20  }
  0x38   :  { %994 = dma.done.wait [#allocation3], 128  }
  0x39   :  { %995 = vsyncadd [#allocation3], 4294967168 }
  0x3a   :  { %996 = dma.done.wait [#allocation6], 4608  }
  0x3b   :  { %997 = vsyncadd [#allocation6], 4294962688 }
  0x3c   :  { %998 = dma.done.wait [#allocation9], 2304  }
  0x3d   :  { %999 = vsyncadd [#allocation9], 4294964992  ;;  %v1011_v0 = vmov 0   ;;  %v800_v1 = vld [vmem:[#allocation5 + $0x14] ss:$8 sps:$4 sm:$0xff]   ;;  %vm137_vm0 = vcmask 261120   ;;  %v107_v7 = vlaneseq }
  0x3e   :  { %173 = vmatprep.mubr.bf16.mxu0 %v1011_v0  ;;  %v802_v2 = vld [vmem:[#allocation5 + $0x10] ss:$8 sps:$4 sm:$0xff]   ;;  %153 = vmatprep.subr.bf16.mxu0 %v800_v1  ;;  %v803_v3 = vld [vmem:[#allocation5 + $0x4] ss:$8 sps:$4 sm:$0xff]   ;;  %v805_v4 = vld [vmem:[#allocation5] ss:$8 sps:$4 sm:$0xff]  }
  0x3f   :  { %154 = vmatpush1.bf16.msra.mxu0 %v802_v2  ;;  %v89_v5 = vld [vmem:[#allocation2] sm:$0xff]  ;;  %v108_v8 = vshrl.u32 %v107_v7, 7  ;;  %v91_v11 = vld [vmem:[#allocation8] ss:$8 sm:$0x3]  ;;  %s1012_s23 = smov [#allocation11]  }
  0x40   :  { %155 = vmatprep.subr.bf16.mxu0 %v803_v3  ;;  %v90_v6 = vpack.c.bf16 %v89_v5, %v89_v5  ;;  %v806_v21 = vld [vmem:[#allocation7 + $0x74] ss:$8 sps:$4 sm:$0xff]   ;;  %v808_v22 = vld [vmem:[#allocation7 + $0x70] ss:$8 sps:$4 sm:$0xff]   ;;  %v809_v23 = vld [vmem:[#allocation7 + $0x64] ss:$8 sps:$4 sm:$0xff]  }
  0x41   :  { %v1069_v9 = vsub.s32 0, %v108_v8  ;;  %v1071_v10 = vsub.s32 1, %v108_v8  ;;  %432 = vmatprep.subr.bf16.mxu1 %v806_v21  ;;  %v811_v24 = vld [vmem:[#allocation7 + $0x60] ss:$8 sps:$4 sm:$0xff]   ;;  %v812_v25 = vld [vmem:[#allocation7 + $0x54] ss:$8 sps:$4 sm:$0xff]  }
  0x42   :  { %433 = vmatpush1.bf16.msra.mxu1 %v808_v22  ;;  %v814_v26 = vld [vmem:[#allocation7 + $0x50] ss:$8 sps:$4 sm:$0xff]   ;;  %v815_v27 = vld [vmem:[#allocation7 + $0x44] ss:$8 sps:$4 sm:$0xff]   ;;  %v817_v28 = vld [vmem:[#allocation7 + $0x40] ss:$8 sps:$4 sm:$0xff]  }
  0x43   :  { %156 = vmatpush1.bf16.msra.mxu0 %v805_v4  ;;  %v110_v12 = vrot.slane %v91_v11, %v1069_v9  ;;  %v114_v13 = vrot.slane %v91_v11, %v1071_v10  ;;  %434 = vmatprep.subr.bf16.mxu1 %v809_v23  ;;  %v818_v29 = vld [vmem:[#allocation7 + $0x34] ss:$8 sps:$4 sm:$0xff]   ;;  %v820_v30 = vld [vmem:[#allocation7 + $0x30] ss:$8 sps:$4 sm:$0xff]   ;;  %v821_v31 = vld [vmem:[#allocation7 + $0x24] ss:$8 sps:$4 sm:$0xff]  }
  0x44   :  { %v823_v32 = vld [vmem:[#allocation7 + $0x20] ss:$8 sps:$4 sm:$0xff]   ;;  %v824_v33 = vld [vmem:[#allocation7 + $0x14] ss:$8 sps:$4 sm:$0xff]   ;;  %v826_v34 = vld [vmem:[#allocation7 + $0x10] ss:$8 sps:$4 sm:$0xff]  }
  0x45   :  { %v827_v35 = vld [vmem:[#allocation7 + $0x4] ss:$8 sps:$4 sm:$0xff]   ;;  %v829_v36 = vld [vmem:[#allocation7] ss:$8 sps:$4 sm:$0xff]   ;;  %v830_v37 = vld [vmem:[#allocation7 + $0xf4] ss:$8 sps:$4 sm:$0xff]  }
  0x46   :  { %717 = vmatmul.mubr.msk.bf16.vlgmr.msra.gmra.mxu0 %vm137_vm0, %v90_v6  ;;  %435 = vmatpush1.bf16.msra.mxu1 %v811_v24  ;;  %v832_v38 = vld [vmem:[#allocation7 + $0xf0] ss:$8 sps:$4 sm:$0xff]   ;;  %v833_v46 = vld [vmem:[#allocation7 + $0xe4] ss:$8 sps:$4 sm:$0xff]   ;;  %v835_v47 = vld [vmem:[#allocation7 + $0xe0] ss:$8 sps:$4 sm:$0xff]  }
  0x47   :  { %436 = vmatprep.subr.bf16.mxu1 %v812_v25  ;;  %v836_v48 = vld [vmem:[#allocation7 + $0xd4] ss:$8 sps:$4 sm:$0xff]   ;;  %v838_v49 = vld [vmem:[#allocation7 + $0xd0] ss:$8 sps:$4 sm:$0xff]   ;;  %v839_v50 = vld [vmem:[#allocation7 + $0xc4] ss:$8 sps:$4 sm:$0xff]  }
  0x48   :  { %v841_v51 = vld [vmem:[#allocation7 + $0xc0] ss:$8 sps:$4 sm:$0xff]   ;;  %v842_v52 = vld [vmem:[#allocation7 + $0xb4] ss:$8 sps:$4 sm:$0xff]   ;;  %v844_v53 = vld [vmem:[#allocation7 + $0xb0] ss:$8 sps:$4 sm:$0xff]  }
  0x49   :  { %v845_v54 = vld [vmem:[#allocation7 + $0xa4] ss:$8 sps:$4 sm:$0xff]   ;;  %v847_v55 = vld [vmem:[#allocation7 + $0xa0] ss:$8 sps:$4 sm:$0xff]   ;;  %v848_v56 = vld [vmem:[#allocation7 + $0x94] ss:$8 sps:$4 sm:$0xff]  }
  0x4a   :  { %437 = vmatpush1.bf16.msra.mxu1 %v814_v26  ;;  %v850_v57 = vld [vmem:[#allocation7 + $0x90] ss:$8 sps:$4 sm:$0xff]   ;;  %v851_v58 = vld [vmem:[#allocation7 + $0x84] ss:$8 sps:$4 sm:$0xff]   ;;  %v853_v59 = vld [vmem:[#allocation7 + $0x80] ss:$8 sps:$4 sm:$0xff]  }
  0x4b   :  { %438 = vmatprep.subr.bf16.mxu1 %v815_v27  ;;  %v93_v63 = vld [vmem:[#allocation8 + $0x1] ss:$8 sm:$0x3]  ;;  %v95_v0 = vld [vmem:[#allocation8 + $0x2] ss:$8 sm:$0x3] }
  0x4c   :  { %v203_v1 = vrot.slane %v93_v63, %v1069_v9  ;;  %v207_v2 = vrot.slane %v93_v63, %v1071_v10  ;;  %v216_v5 = vrot.slane %v95_v0, %v1069_v9  ;;  %v220_v6 = vrot.slane %v95_v0, %v1071_v10  ;;  %s702_s24 = sshll.u32 %s1012_s23, 4  ;;  %s703_s24 = int_to_ptr.vmem [resolvable:$true] %s702_s24 }
  0x4d   :  { %s974_s25 = scalar_lea.vmem %s703_s24, 64  ;;  %p979_p12 = scmp.lt.s32.totalorder %s703_s24, %s703_s24 }
  0x4e   :  { %439 = vmatpush1.bf16.msra.mxu1 %v817_v28  ;;  %v854_v28 = vld [vmem:[#allocation10 + $0x78] sm:$0xff]   ;;  %p975_p11 = scmp.ne.s32.totalorder %s703_s24, %s974_s25  ;;  %p980_p13 = scmp.lt.s32.totalorder %s974_s25, %s974_s25 }
  0x4f   :  { %440 = vmatprep.subr.bf16.mxu1 %v818_v29  ;;  %v855_v29 = vld [vmem:[#allocation10 + $0x38] sm:$0xff]   ;;  %767 = vmatprep.subr.bf16.mxu0 %v854_v28 }
  0x50   :  { %768 = vmatpush3.bf16.msra.mxu0 %v855_v29  ;;  %p981_p0 = por %p980_p13, %p979_p12 }
  0x52   :  { %441 = vmatpush1.bf16.msra.mxu1 %v820_v30  ;;  %p982_p1 = pnand %p981_p0, %p975_p11 }
  0x53   :  { %442 = vmatprep.subr.bf16.mxu1 %v821_v31 }
  0x56   :  { %443 = vmatpush1.bf16.msra.mxu1 %v823_v32 }
  0x57   :  { %444 = vmatprep.subr.bf16.mxu1 %v824_v33 }
  0x5a   :  { %445 = vmatpush1.bf16.msra.mxu1 %v826_v34 }
  0x5b   :  { %446 = vmatprep.subr.bf16.mxu1 %v827_v35 }
  0x5e   :  { %447 = vmatpush1.bf16.msra.mxu1 %v829_v36 }
  0x5f   :  { %448 = vmatprep.subr.bf16.mxu1 %v830_v37  ;;  %v856_v37 = vld [vmem:[#allocation10 + $0x70] sm:$0xff]  }
  0x60   :  { %769 = vmatprep.subr.bf16.mxu0 %v856_v37 }
  0x62   :  { %449 = vmatpush2.bf16.msra.mxu1 %v832_v38  ;;  %v857_v38 = vld [vmem:[#allocation10 + $0x30] sm:$0xff]  }
  0x63   :  { %450 = vmatprep.subr.bf16.mxu1 %v833_v46  ;;  %770 = vmatpush3.bf16.msra.mxu0 %v857_v38  ;;  %v865_v46 = vld [vmem:[#allocation10 + $0x10] sm:$0xff]  }
  0x66   :  { %451 = vmatpush2.bf16.msra.mxu1 %v835_v47  ;;  %v866_v47 = vld [vmem:[#allocation10 + $0x48] sm:$0xff]  }
  0x67   :  { %452 = vmatprep.subr.bf16.mxu1 %v836_v48  ;;  %v867_v48 = vld [vmem:[#allocation10 + $0x8] sm:$0xff]  }
  0x6a   :  { %453 = vmatpush2.bf16.msra.mxu1 %v838_v49  ;;  %v868_v49 = vld [vmem:[#allocation10 + $0x40] sm:$0xff]  }
  0x6b   :  { %454 = vmatprep.subr.bf16.mxu1 %v839_v50  ;;  %v869_v50 = vld [vmem:[#allocation10] sm:$0xff]  }
  0x6e   :  { %455 = vmatpush2.bf16.msra.mxu1 %v841_v51 }
  0x6f   :  { %456 = vmatprep.subr.bf16.mxu1 %v842_v52 }
  0x72   :  { %457 = vmatpush2.bf16.msra.mxu1 %v844_v53 }
  0x73   :  { %458 = vmatprep.subr.bf16.mxu1 %v845_v54  ;;  %v99_v54 = vld [vmem:[#allocation8 + $0x4] ss:$8 sm:$0x3] }
  0x76   :  { %459 = vmatpush2.bf16.msra.mxu1 %v847_v55  ;;  %v101_v55 = vld [vmem:[#allocation8 + $0x5] ss:$8 sm:$0x3] }
  0x77   :  { %460 = vmatprep.subr.bf16.mxu1 %v848_v56  ;;  %v493_v56 = vrot.slane %v99_v54, %v1069_v9 }
  0x7a   :  { %461 = vmatpush2.bf16.msra.mxu1 %v850_v57  ;;  %v497_v57 = vrot.slane %v99_v54, %v1071_v10 }
  0x7b   :  { %462 = vmatprep.subr.bf16.mxu1 %v851_v58 }
  0x7e   :  { %463 = vmatpush2.bf16.msra.mxu1 %v853_v59 }
 0x106   :  { %v175_v14 = vpop.f32.mrf.mxu0 }
 0x107   :  { %v176_v16 = vadd.f32 %v175_v14, %v110_v12 }
 0x108   :  { %v177_v15 = vpop.f32.mrf.mxu0 }
 0x109   :  { %v178_v17 = vadd.f32 %v177_v15, %v114_v13 }
 0x10a   :  { %v179_v18 = vpop.f32.mrf.mxu0 }
 0x10b   :  { %v182_v19 = vadd.f32 %v178_v17, %v176_v16  ;;  %v97_v18 = vld [vmem:[#allocation8 + $0x3] ss:$8 sm:$0x3] }
 0x10c   :  { %v180_v20 = vpop.f32.mrf.mxu0 }
 0x10d   :  { %183 = vadd.xlane.f32.xlu0 %v182_v19  ;;  %v265_v19 = vrot.slane %v97_v18, %v1069_v9  ;;  %v269_v20 = vrot.slane %v97_v18, %v1071_v10 }
 0x196   :  { %v184_v39 = vpop.xlane.xlu0 %183 }
 0x197   :  { %v186_v40 = vmul.f32 0.00390625, %v184_v39  ;;  %v858_v39 = vld [vmem:[#allocation10 + $0x68] sm:$0xff]  }
 0x198   :  { %771 = vmatprep.subr.bf16.mxu0 %v858_v39 }
 0x199   :  { %v187_v41 = vsub.f32 %v176_v16, %v186_v40  ;;  %v188_v42 = vsub.f32 %v178_v17, %v186_v40  ;;  %v859_v40 = vld [vmem:[#allocation10 + $0x28] sm:$0xff]  }
 0x19a   :  { %772 = vmatpush3.bf16.msra.mxu0 %v859_v40 }
 0x19b   :  { %v189_v43 = vmul.f32 %v187_v41, %v187_v41  ;;  %v190_v44 = vmul.f32 %v188_v42, %v188_v42 }
 0x19d   :  { %v191_v45 = vadd.f32 %v190_v44, %v189_v43  ;;  %v862_v43 = vld [vmem:[#allocation10 + $0x58] sm:$0xff]  }
 0x19e   :  { %v863_v44 = vld [vmem:[#allocation10 + $0x18] sm:$0xff]  }
 0x19f   :  { %192 = vadd.xlane.f32.xlu0 %v191_v45  ;;  %v864_v45 = vld [vmem:[#allocation10 + $0x50] sm:$0xff]  }
 0x228   :  { %v193_v60 = vpop.xlane.xlu0 %192 }
 0x229   :  { %v194_v61 = vmul.f32 0.00390625, %v193_v60  ;;  %v506_v60 = vrot.slane %v101_v55, %v1069_v9 }
 0x22b   :  { %v195_v62 = vadd.f32 1e-05, %v194_v61  ;;  %v510_v61 = vrot.slane %v101_v55, %v1071_v10 }
 0x22d   :  { %870 = vrsqrt.f32 %v195_v62 }
 0x23a   :  { %v871_v3 = vpop.eup %870 }
 0x23b   :  { %v198_v4 = vmul.f32 %v871_v3, %v188_v42  ;;  %v197_v7 = vmul.f32 %v871_v3, %v187_v41  ;;  %v860_v41 = vld [vmem:[#allocation10 + $0x60] sm:$0xff]  }
 0x23c   :  { %v861_v42 = vld [vmem:[#allocation10 + $0x20] sm:$0xff]   ;;  %773 = vmatprep.subr.bf16.mxu0 %v860_v41 }
 0x23d   :  { %v211_v8 = vmul.f32 %v207_v2, %v198_v4  ;;  %v210_v11 = vmul.f32 %v203_v1, %v197_v7  ;;  %774 = vmatpush3.bf16.msra.mxu0 %v861_v42 }
 0x23e   :  { %775 = vmatprep.subr.bf16.mxu0 %v862_v43 }
 0x23f   :  { %v224_v12 = vadd.f32 %v220_v6, %v211_v8  ;;  %v223_v13 = vadd.f32 %v216_v5, %v210_v11  ;;  %v750_v8 = vld [vmem:[%s1096_s5] ss:$0 sm:$0xff] }
 0x241   :  { %v226_v14 = vmax.f32 %v224_v12, 0.0  ;;  %v225_v15 = vmax.f32 %v223_v13, 0.0  ;;  %776 = vmatpush3.bf16.msra.mxu0 %v863_v44 }
 0x242   :  { %777 = vmatprep.subr.bf16.mxu0 %v864_v45 }
 0x243   :  { %v228_v16 = vpack.c.bf16 %v226_v14, %v226_v14  ;;  %v227_v17 = vpack.c.bf16 %v225_v15, %v225_v15 }
 0x245   :  { %464 = vmatprep.mubr.bf16.mxu1 %v228_v16  ;;  %778 = vmatpush3.bf16.msra.mxu0 %v865_v46 }
 0x246   :  { %465 = vmatmul.mubr.bf16.vlgmr.msra.gmra.mxu1 %v227_v17  ;;  %779 = vmatprep.subr.bf16.mxu0 %v866_v47 }
 0x249   :  { %780 = vmatpush3.bf16.msra.mxu0 %v867_v48 }
 0x24a   :  { %781 = vmatprep.subr.bf16.mxu0 %v868_v49 }
 0x24d   :  { %782 = vmatpush3.bf16.msra.mxu0 %v869_v50 }
 0x306   :  { %v466_v21 = vpop.f32.mrf.mxu1 }
 0x307   :  { %v467_v23 = vadd.f32 %v466_v21, %v265_v19 }
 0x308   :  { %v468_v22 = vpop.f32.mrf.mxu1 }
 0x309   :  { %v469_v24 = vadd.f32 %v468_v22, %v269_v20 }
 0x30a   :  { %v470_v25 = vpop.f32.mrf.mxu1 }
 0x30b   :  { %v473_v26 = vadd.f32 %v469_v24, %v467_v23 }
 0x30c   :  { %v471_v27 = vpop.f32.mrf.mxu1 }
 0x30d   :  { %474 = vadd.xlane.f32.xlu1 %v473_v26 }
 0x396   :  { %v475_v30 = vpop.xlane.xlu1 %474 }
 0x397   :  { %v476_v31 = vmul.f32 0.00390625, %v475_v30 }
 0x399   :  { %v477_v32 = vsub.f32 %v467_v23, %v476_v31  ;;  %v478_v33 = vsub.f32 %v469_v24, %v476_v31 }
 0x39b   :  { %v479_v34 = vmul.f32 %v477_v32, %v477_v32  ;;  %v480_v35 = vmul.f32 %v478_v33, %v478_v33 }
 0x39d   :  { %v481_v36 = vadd.f32 %v480_v35, %v479_v34 }
 0x39f   :  { %482 = vadd.xlane.f32.xlu1 %v481_v36 }
 0x428   :  { %v483_v51 = vpop.xlane.xlu1 %482 }
 0x429   :  { %v484_v52 = vmul.f32 0.00390625, %v483_v51 }
 0x42b   :  { %v485_v53 = vadd.f32 1e-05, %v484_v52 }
 0x42d   :  { %872 = vrsqrt.f32 %v485_v53 }
 0x43a   :  { %v873_v58 = vpop.eup %872 }
 0x43b   :  { %v488_v59 = vmul.f32 %v873_v58, %v478_v33  ;;  %v487_v62 = vmul.f32 %v873_v58, %v477_v32 }
 0x43d   :  { %v501_v63 = vmul.f32 %v497_v57, %v488_v59  ;;  %v500_v0 = vmul.f32 %v493_v56, %v487_v62 }
 0x43f   :  { %v514_v1 = vadd.f32 %v510_v61, %v501_v63  ;;  %v513_v2 = vadd.f32 %v506_v60, %v500_v0 }
 0x441   :  { %v516_v3 = vmax.f32 %v514_v1, 0.0  ;;  %v515_v4 = vmax.f32 %v513_v2, 0.0 }
 0x443   :  { %v518_v5 = vpack.c.bf16 %v516_v3, %v516_v3  ;;  %v517_v6 = vpack.c.bf16 %v515_v4, %v515_v4 }
 0x445   :  { %686 = vmatprep.mubr.bf16.mxu0 %v518_v5 }
 0x446   :  { %687 = vmatmul.mubr.bf16.vlgmr.msra.gmra.mxu0 %v517_v6 }
 0x506   :  { %v783_v7 = vpop.f32.mrf.mxu0 }
 0x508   :  { %v784_v11 = vpop.f32.mrf.mxu0 }
 0x509   :  { %v785_v9 = vadd.f32 %v784_v11, %v783_v7 }
 0x50a   :  { %v786_v12 = vpop.f32.mrf.mxu0 }
 0x50b   :  { %v689_v10 = vadd.f32 %v785_v9, %v750_v8 }
 0x50c   :  { %v787_v13 = vpop.f32.mrf.mxu0 }
 0x50d   :  { %v694_v14 = vpack.c.bf16 %v689_v10, %v689_v10 }
 0x50f   :  { %695 = vst [vmem:[#allocation11] sm:$0xf] %v694_v14 }
 0x510   :  { %985 = shalt.err (!%p982_p1)
}
 0x511   :  { %705 = dma.vmem_to_hbm [thread:$0]  %s703_s24, 64, %s1097_s6, [#allocation4]  }
 0x512   :  { %1000 = dma.done.wait [#allocation4], 64  }
 0x513   :  { %1001 = vsyncadd [#allocation4], 4294967232 }
 0x514   :  { %709 = vsyncpa [#allocation3], 1 }
 0x515   :  { %710 = vsyncpa [#allocation6], 1 }
 0x516   :  { %711 = vsyncpa [#allocation9], 1 }
 0x517   :  { %712 = vsyncpa [#allocation4], 1 }

</bundles_post_ra>
